<compile_context>
chip_gen: v6e
topology: v6e:2x2x1
jax: 0.10.0
libtpu: 0.0.40
codegen_flags: <defaults>
</compile_context>

<pallas_src>
import jax
import jax.numpy as jnp
from jax.experimental import pallas as pl
from jax.experimental.pallas import tpu as pltpu


def _fused_concat_linear_kernel(x_ref, w_ref, b_ref, o_ref):
    # x_ref : (B, H_in)
    # w_ref : (H_in, n*H_out)   -- concat of W_i.T along the output/lane dim
    # b_ref : (1, n*H_out)
    # o_ref : (B, n*H_out)      -- the already-concatenated output slab
    acc = jnp.dot(x_ref[...], w_ref[...], preferred_element_type=jnp.float32)
    acc = acc + b_ref[...]  # (1, n*H_out) broadcasts over the B rows
    o_ref[...] = acc.astype(o_ref.dtype)


def module_concat_linear(x, w, b):
    """Pallas implementation of ModuleConcat(nn.Linear, n, dim=-1).

    Args:
      x: (B, H_in)          float32
      w: (n, H_in, H_out)   float32  (i.e. torch W_i.T stacked over i)
      b: (n, H_out)         float32
    Returns:
      (B, n * H_out) float32  == torch.cat([x @ W_i.T + b_i for i], dim=-1)
    """
    B, H_in = x.shape
    n, _, H_out = w.shape
    N_out = n * H_out

    # Pre-layout: concat the n weight matrices along the output (lane) dim.
    # (n, H_in, H_out) -> (H_in, n, H_out) -> (H_in, n*H_out), which equals
    # jnp.concatenate([w[i] for i in range(n)], axis=1) exactly.
    w_cat = jnp.transpose(w, (1, 0, 2)).reshape(H_in, N_out)
    b_cat = b.reshape(1, N_out)

    itemsize = x.dtype.itemsize
    cost = pl.CostEstimate(
        flops=2 * B * H_in * N_out,
        transcendentals=0,
        bytes_accessed=(x.size + w_cat.size + b_cat.size + B * N_out) * itemsize,
    )

    return pl.pallas_call(
        _fused_concat_linear_kernel,
        out_shape=jax.ShapeDtypeStruct((B, N_out), x.dtype),
        # No grid: the whole (tiny) operands live in VMEM; single invocation,
        # single lane-dense output writeback.
        in_specs=[
            pl.BlockSpec(memory_space=pltpu.MemorySpace.VMEM),
            pl.BlockSpec(memory_space=pltpu.MemorySpace.VMEM),
            pl.BlockSpec(memory_space=pltpu.MemorySpace.VMEM),
        ],
        out_specs=pl.BlockSpec(memory_space=pltpu.MemorySpace.VMEM),
        cost_estimate=cost,
    )(x, w_cat, b_cat)


if __name__ == "__main__":
    # Small, TPU-friendly shapes consistent with the module's forward
    # (ModuleConcat(nn.Linear, n=3, dim=-1, in_features=128, out_features=128)).
    B, H_in, H_out, N = 8, 128, 128, 3

    key = jax.random.PRNGKey(0)
    kx, kw, kb = jax.random.split(key, 3)

    x = jax.random.normal(kx, (B, H_in), dtype=jnp.float32)
    # Deterministic parameter init for the N Linear modules (synthetic, not a checkpoint).
    w = jax.random.normal(kw, (N, H_in, H_out), dtype=jnp.float32) * 0.02
    b = jax.random.normal(kb, (N, H_out), dtype=jnp.float32) * 0.01

    out = module_concat_linear(x, w, b)
    out = jax.block_until_ready(out)

    # Pure-JAX reference: cat([x @ W_i + b_i for i], axis=-1)
    ref = jnp.concatenate([x @ w[i] + b[i][None, :] for i in range(N)], axis=-1)

    assert out.shape == (B, N * H_out), out.shape
    assert jnp.allclose(out, ref, atol=1e-4, rtol=1e-4)
    print("KERNEL_OK")
</pallas_src>

<mosaic_0001>
module attributes {stable_mosaic.version = 11 : i64} {
  func.func @_fused_concat_linear_kernel(%arg0: memref<8x128xf32, #tpu.memory_space<vmem>>, %arg1: memref<128x384xf32, #tpu.memory_space<vmem>>, %arg2: memref<1x384xf32, #tpu.memory_space<vmem>>, %arg3: memref<8x384xf32, #tpu.memory_space<vmem>>) attributes {dimension_semantics = [], scalar_prefetch = 0 : i64, scratch_operands = 0 : i64, tpu.core_type = #tpu.core_type<tc>} {
    %c0 = arith.constant 0 : index
    %c0_0 = arith.constant 0 : index
    %0 = vector.load %arg0[%c0, %c0_0] : memref<8x128xf32, #tpu.memory_space<vmem>>, vector<8x128xf32>
    %c0_1 = arith.constant 0 : index
    %c0_2 = arith.constant 0 : index
    %1 = vector.load %arg1[%c0_1, %c0_2] : memref<128x384xf32, #tpu.memory_space<vmem>>, vector<128x384xf32>
    %cst = arith.constant dense<0.000000e+00> : vector<8x384xf32>
    %2 = tpu.matmul %0, %1, %cst {dimension_numbers = #tpu.dot_dimension_numbers<[1], [0], [0], [1], [0, 0, 1, 1], [], []>} : vector<8x128xf32>, vector<128x384xf32>, vector<8x384xf32> -> vector<8x384xf32>
    %c0_3 = arith.constant 0 : index
    %c0_4 = arith.constant 0 : index
    %3 = vector.load %arg2[%c0_3, %c0_4] : memref<1x384xf32, #tpu.memory_space<vmem>>, vector<1x384xf32>
    %4 = vector.broadcast %3 : vector<1x384xf32> to vector<8x384xf32>
    %5 = arith.addf %2, %4 : vector<8x384xf32>
    %c0_5 = arith.constant 0 : index
    %c0_6 = arith.constant 0 : index
    %6 = vector.load %arg3[%c0_5, %c0_6] : memref<8x384xf32, #tpu.memory_space<vmem>>, vector<8x384xf32>
    tpu.vector_store %arg3[%c0_5, %c0_6], %5 {strides = array<i32>} : memref<8x384xf32, #tpu.memory_space<vmem>>, vector<8x384xf32>,
    return
  }
}

</mosaic_0001>

<bundles_post_ra>
// kernel: tpu_custom_call.1
= control target key start
LH: loop header
LB: loop body
LE: loop exit
PB: predicated region body
PF: predicated region fallthrough
CT: control target
= control target key end

     0   :  { %8 = vsyncpa [#allocation3], 0  ;;  %s449_s0 = inlined_call_operand.hbm [shape: f32[8,128], index: 0, kind: input, shape index: {}]   ;;  %s450_s1 = inlined_call_operand.hbm [shape: f32[128,384], index: 1, kind: input, shape index: {}]   ;;  %s451_s2 = inlined_call_operand.vmem [shape: f32[1,384], index: 2, kind: input, shape index: {}]   ;;  %s452_s3 = inlined_call_operand.hbm [shape: f32[8,384], index: 3, kind: output, shape index: {}]  }
   0x1   :  { %9 = vsyncpa [#allocation6], 0 }
   0x2   :  { %10 = vsyncpa [#allocation4], 0  ;;  %s392_s12 = smov [#allocation2]   ;;  %s393_s14 = smov [#allocation5]  }
   0x3   :  { %s17_s13 = sshll.u32 %s392_s12, 4  ;;  %s26_s15 = sshll.u32 %s393_s14, 4  ;;  %s18_s13 = int_to_ptr.vmem [resolvable:$true] %s17_s13  ;;  %s27_s15 = int_to_ptr.vmem [resolvable:$true] %s26_s15 }
   0x4   :  { %s334_s16 = scalar_lea.vmem %s18_s13, 128  ;;  %p339_p1 = scmp.lt.s32.totalorder %s18_s13, %s18_s13 }
   0x5   :  { %p335_p0 = scmp.ne.s32.totalorder %s18_s13, %s334_s16  ;;  %p340_p2 = scmp.lt.s32.totalorder %s334_s16, %s334_s16 }
   0x7   :  { %p341_p3 = por %p340_p2, %p339_p1 }
   0x9   :  { %p342_p4 = pnand %p341_p3, %p335_p0 }
   0xb   :  { %345 = shalt.err (!%p342_p4)
}
   0xc   :  { %20 = dma.hbm_to_vmem [thread:$0]  %s449_s0, 128, %s18_s13, [#allocation3]  }
   0xd   :  { %s354_s19 = scalar_lea.vmem %s27_s15, 6144  ;;  %p359_p6 = scmp.lt.s32.totalorder %s27_s15, %s27_s15 }
   0xe   :  { %p355_p5 = scmp.ne.s32.totalorder %s27_s15, %s354_s19  ;;  %p360_p7 = scmp.lt.s32.totalorder %s354_s19, %s354_s19 }
  0x10   :  { %p361_p8 = por %p360_p7, %p359_p6 }
  0x12   :  { %p362_p9 = pnand %p361_p8, %p355_p5 }
  0x14   :  { %365 = shalt.err (!%p362_p9)
}
  0x15   :  { %s394_s20 = smov 384   ;;  %s395_s21 = smov 24  }
  0x16   :  { %32 = dma.hbm_to_vmem [thread:$0]  %s450_s1, 6144, %s27_s15, [#allocation6], %s394_s20, %s394_s20, %s395_s21  }
  0x17   :  { %386 = dma.done.wait [#allocation3], 128  }
  0x18   :  { %387 = vsyncadd [#allocation3], 4294967168 }
  0x19   :  { %388 = dma.done.wait [#allocation6], 6144  }
  0x1a   :  { %389 = vsyncadd [#allocation6], 4294961152  ;;  %v396_v0 = vmov 0.0   ;;  %vm397_vm0 = vmmov 0   ;;  %v88_v1 = vld [vmem:[#allocation5 + $0x170] sm:$0xff]  ;;  %v87_v2 = vld [vmem:[#allocation5 + $0x168] sm:$0xff]  ;;  %v92_v50 = vlaneseq }
  0x1b   :  { %284 = vmatprep.subr.mxu1 %v396_v0  ;;  %171 = vmatprep.mubr.f32.mxu0 %v396_v0  ;;  %v89_v3 = vld [vmem:[#allocation5 + $0x178] sm:$0xff]  ;;  %v84_v5 = vld [vmem:[#allocation5 + $0x150] sm:$0xff]  ;;  %v86_v6 = vld [vmem:[#allocation5 + $0x160] sm:$0xff]  ;;  %s398_s24 = smov [#allocation7]  }
  0x1c   :  { %316 = vmatprep.mubr.msk.f32.mxu1 %vm397_vm0, %v396_v0  ;;  %107 = vmatprep.subr.mxu0 %v88_v1  ;;  %v85_v4 = vld [vmem:[#allocation5 + $0x158] sm:$0xff]  ;;  %v82_v7 = vld [vmem:[#allocation5 + $0x140] sm:$0xff]  ;;  %v83_v8 = vld [vmem:[#allocation5 + $0x148] sm:$0xff]  ;;  %v93_v51 = vshrl.u32 %v92_v50, 7  ;;  %s257_s25 = sshll.u32 %s398_s24, 4  ;;  %s258_s25 = int_to_ptr.vmem [resolvable:$true] %s257_s25 }
  0x1d   :  { %285 = vmatpush3.msra.mxu1 %v89_v3  ;;  %108 = vmatpush1.msra.mxu0 %v87_v2  ;;  %v81_v9 = vld [vmem:[#allocation5 + $0x138] sm:$0xff]  ;;  %v79_v10 = vld [vmem:[#allocation5 + $0x128] sm:$0xff]  ;;  %v80_v11 = vld [vmem:[#allocation5 + $0x130] sm:$0xff]  ;;  %s366_s26 = scalar_lea.vmem %s258_s25, 384  ;;  %p371_p11 = scmp.lt.s32.totalorder %s258_s25, %s258_s25 }
  0x1e   :  { %286 = vmatprep.subr.mxu1 %v396_v0  ;;  %109 = vmatprep.subr.mxu0 %v85_v4  ;;  %v78_v12 = vld [vmem:[#allocation5 + $0x120] sm:$0xff]  ;;  %v76_v13 = vld [vmem:[#allocation5 + $0x110] sm:$0xff]  ;;  %v77_v14 = vld [vmem:[#allocation5 + $0x118] sm:$0xff]  ;;  %v102_v52 = vsub.s32 2, %v93_v51  ;;  %v94_v53 = vsub.s32 0, %v93_v51  ;;  %v98_v55 = vsub.s32 1, %v93_v51  ;;  %p367_p10 = scmp.ne.s32.totalorder %s258_s25, %s366_s26  ;;  %p372_p12 = scmp.lt.s32.totalorder %s366_s26, %s366_s26 }
  0x1f   :  { %287 = vmatpush3.msra.mxu1 %v86_v6  ;;  %110 = vmatpush1.msra.mxu0 %v84_v5  ;;  %v75_v15 = vld [vmem:[#allocation5 + $0x108] sm:$0xff]  ;;  %v73_v16 = vld [vmem:[#allocation5 + $0xf8] sm:$0xff]  ;;  %v74_v17 = vld [vmem:[#allocation5 + $0x100] sm:$0xff] }
  0x20   :  { %288 = vmatprep.subr.mxu1 %v396_v0  ;;  %111 = vmatprep.subr.mxu0 %v82_v7  ;;  %v72_v18 = vld [vmem:[#allocation5 + $0xf0] sm:$0xff]  ;;  %v70_v19 = vld [vmem:[#allocation5 + $0xe0] sm:$0xff]  ;;  %v71_v20 = vld [vmem:[#allocation5 + $0xe8] sm:$0xff]  ;;  %p373_p13 = por %p372_p12, %p371_p11 }
  0x21   :  { %289 = vmatpush3.msra.mxu1 %v83_v8  ;;  %112 = vmatpush1.msra.mxu0 %v81_v9  ;;  %v69_v21 = vld [vmem:[#allocation5 + $0xd8] sm:$0xff]  ;;  %v67_v22 = vld [vmem:[#allocation5 + $0xc8] sm:$0xff]  ;;  %v68_v23 = vld [vmem:[#allocation5 + $0xd0] sm:$0xff] }
  0x22   :  { %290 = vmatprep.subr.mxu1 %v396_v0  ;;  %113 = vmatprep.subr.mxu0 %v79_v10  ;;  %v66_v24 = vld [vmem:[#allocation5 + $0xc0] sm:$0xff]  ;;  %v64_v25 = vld [vmem:[#allocation5 + $0xb0] sm:$0xff]  ;;  %v65_v26 = vld [vmem:[#allocation5 + $0xb8] sm:$0xff]  ;;  %p374_p0 = pnand %p373_p13, %p367_p10 }
  0x23   :  { %291 = vmatpush3.msra.mxu1 %v80_v11  ;;  %114 = vmatpush1.msra.mxu0 %v78_v12  ;;  %v63_v27 = vld [vmem:[#allocation5 + $0xa8] sm:$0xff]  ;;  %v61_v28 = vld [vmem:[#allocation5 + $0x98] sm:$0xff]  ;;  %v62_v29 = vld [vmem:[#allocation5 + $0xa0] sm:$0xff] }
  0x24   :  { %292 = vmatprep.subr.mxu1 %v396_v0  ;;  %115 = vmatprep.subr.mxu0 %v76_v13  ;;  %v60_v30 = vld [vmem:[#allocation5 + $0x90] sm:$0xff]  ;;  %v58_v31 = vld [vmem:[#allocation5 + $0x80] sm:$0xff]  ;;  %v59_v32 = vld [vmem:[#allocation5 + $0x88] sm:$0xff] }
  0x25   :  { %293 = vmatpush3.msra.mxu1 %v77_v14  ;;  %116 = vmatpush1.msra.mxu0 %v75_v15  ;;  %v57_v33 = vld [vmem:[#allocation5 + $0x78] sm:$0xff]  ;;  %v55_v34 = vld [vmem:[#allocation5 + $0x68] sm:$0xff]  ;;  %v56_v35 = vld [vmem:[#allocation5 + $0x70] sm:$0xff] }
  0x26   :  { %294 = vmatprep.subr.mxu1 %v396_v0  ;;  %117 = vmatprep.subr.mxu0 %v73_v16  ;;  %v54_v36 = vld [vmem:[#allocation5 + $0x60] sm:$0xff]  ;;  %v52_v37 = vld [vmem:[#allocation5 + $0x50] sm:$0xff]  ;;  %v53_v38 = vld [vmem:[#allocation5 + $0x58] sm:$0xff] }
  0x27   :  { %295 = vmatpush3.msra.mxu1 %v74_v17  ;;  %118 = vmatpush1.msra.mxu0 %v72_v18  ;;  %v51_v39 = vld [vmem:[#allocation5 + $0x48] sm:$0xff]  ;;  %v49_v40 = vld [vmem:[#allocation5 + $0x38] sm:$0xff]  ;;  %v50_v41 = vld [vmem:[#allocation5 + $0x40] sm:$0xff] }
  0x28   :  { %296 = vmatprep.subr.mxu1 %v396_v0  ;;  %119 = vmatprep.subr.mxu0 %v70_v19  ;;  %v48_v42 = vld [vmem:[#allocation5 + $0x30] sm:$0xff]  ;;  %v46_v43 = vld [vmem:[#allocation5 + $0x20] sm:$0xff]  ;;  %v47_v44 = vld [vmem:[#allocation5 + $0x28] sm:$0xff] }
  0x29   :  { %297 = vmatpush3.msra.mxu1 %v71_v20  ;;  %120 = vmatpush1.msra.mxu0 %v69_v21  ;;  %v45_v45 = vld [vmem:[#allocation5 + $0x18] sm:$0xff]  ;;  %v43_v46 = vld [vmem:[#allocation5 + $0x8] sm:$0xff]  ;;  %v44_v47 = vld [vmem:[#allocation5 + $0x10] sm:$0xff] }
  0x2a   :  { %298 = vmatprep.subr.mxu1 %v396_v0  ;;  %121 = vmatprep.subr.mxu0 %v67_v22  ;;  %v42_v48 = vld [vmem:[#allocation5] sm:$0xff]  ;;  %v41_v49 = vld [vmem:[#allocation2] sm:$0xff] }
  0x2b   :  { %299 = vmatpush3.msra.mxu1 %v68_v23  ;;  %122 = vmatpush1.msra.mxu0 %v66_v24  ;;  %v90_v54 = vld [vmem:[%s451_s2] sm:$0x7] }
  0x2c   :  { %300 = vmatprep.subr.mxu1 %v396_v0  ;;  %123 = vmatprep.subr.mxu0 %v64_v25  ;;  %v103_v56 = vrot.slane %v90_v54, %v102_v52  ;;  %v95_v57 = vrot.slane %v90_v54, %v94_v53  ;;  %v99_v59 = vrot.slane %v90_v54, %v98_v55 }
  0x2d   :  { %301 = vmatpush3.msra.mxu1 %v65_v26  ;;  %124 = vmatpush1.msra.mxu0 %v63_v27 }
  0x2e   :  { %302 = vmatprep.subr.mxu1 %v396_v0  ;;  %125 = vmatprep.subr.mxu0 %v61_v28 }
  0x2f   :  { %303 = vmatpush3.msra.mxu1 %v62_v29  ;;  %126 = vmatpush1.msra.mxu0 %v60_v30 }
  0x30   :  { %304 = vmatprep.subr.mxu1 %v396_v0  ;;  %127 = vmatprep.subr.mxu0 %v58_v31 }
  0x31   :  { %305 = vmatpush3.msra.mxu1 %v59_v32  ;;  %128 = vmatpush1.msra.mxu0 %v57_v33 }
  0x32   :  { %306 = vmatprep.subr.mxu1 %v396_v0  ;;  %129 = vmatprep.subr.mxu0 %v55_v34 }
  0x33   :  { %307 = vmatpush3.msra.mxu1 %v56_v35  ;;  %130 = vmatpush1.msra.mxu0 %v54_v36 }
  0x34   :  { %308 = vmatprep.subr.mxu1 %v396_v0  ;;  %131 = vmatprep.subr.mxu0 %v52_v37 }
  0x35   :  { %309 = vmatpush3.msra.mxu1 %v53_v38  ;;  %132 = vmatpush1.msra.mxu0 %v51_v39 }
  0x36   :  { %310 = vmatprep.subr.mxu1 %v396_v0  ;;  %133 = vmatprep.subr.mxu0 %v49_v40 }
  0x37   :  { %311 = vmatpush3.msra.mxu1 %v50_v41  ;;  %134 = vmatpush1.msra.mxu0 %v48_v42 }
  0x38   :  { %312 = vmatprep.subr.mxu1 %v396_v0  ;;  %135 = vmatprep.subr.mxu0 %v46_v43 }
  0x39   :  { %313 = vmatpush3.msra.mxu1 %v47_v44  ;;  %136 = vmatpush1.msra.mxu0 %v45_v45 }
  0x3a   :  { %314 = vmatprep.subr.mxu1 %v396_v0  ;;  %137 = vmatprep.subr.mxu0 %v43_v46 }
  0x3b   :  { %315 = vmatpush3.msra.mxu1 %v44_v47  ;;  %138 = vmatpush1.msra.mxu0 %v42_v48 }
  0x3c   :  { %317 = vmatmul.mubr.f32.vlgmr.msra.gmra.mxu1 %v41_v49  ;;  %172 = vmatmul.mubr.f32.vlgmr.msra.gmra.mxu0 %v41_v49 }
  0xfc   :  { %v244_v58 = vpop.f32.mrf.mxu1  ;;  %v173_v60 = vpop.f32.mrf.mxu0 }
  0xfd   :  { %v245_v61 = vadd.f32 %v244_v58, %v103_v56  ;;  %v174_v62 = vadd.f32 %v173_v60, %v95_v57 }
  0xfe   :  { %v318_v63 = vpop.f32.mrf.mxu1  ;;  %v175_v0 = vpop.f32.mrf.mxu0 }
  0xff   :  { %250 = vst [vmem:[#allocation7 + $0x10] sm:$0xff] %v245_v61  ;;  %248 = vst [vmem:[#allocation7] sm:$0xff] %v174_v62  ;;  %v176_v1 = vadd.f32 %v175_v0, %v99_v59 }
 0x101   :  { %249 = vst [vmem:[#allocation7 + $0x8] sm:$0xff] %v176_v1 }
 0x102   :  { %377 = shalt.err (!%p374_p0)
}
 0x103   :  { %260 = dma.vmem_to_hbm [thread:$0]  %s258_s25, 384, %s452_s3, [#allocation4]  }
 0x104   :  { %390 = dma.done.wait [#allocation4], 384  }
 0x105   :  { %391 = vsyncadd [#allocation4], 4294966912 }
 0x106   :  { %264 = vsyncpa [#allocation3], 1 }
 0x107   :  { %265 = vsyncpa [#allocation6], 1 }
 0x108   :  { %266 = vsyncpa [#allocation4], 1 }

</bundles_post_ra>
